<compile_context>
chip_gen: v6e
topology: v6e:2x2x1
jax: 0.10.0
libtpu: 0.0.40
codegen_flags: <defaults>
</compile_context>

<pallas_src>
import functools

import jax
import jax.numpy as jnp
from jax.experimental import pallas as pl
from jax.experimental.pallas import tpu as pltpu

LANE = 128
SUBLANE = 8
_TARGET_BLOCK_BYTES = 4 * 1024 * 1024   # 2-4 MiB plateau; safe on v7x's 64 MiB VMEM


def _round_up(x, m):
    return ((x + m - 1) // m) * m


def _num_tensorcores():
    """Best-effort TensorCore count per JAX device (used only for grid shaping)."""
    try:
        kind = jax.devices()[0].device_kind.lower()
    except Exception:
        return 1
    # Single-TC chips (and v2/v3, whose TCs are separate JAX devices).
    if "lite" in kind or "v5e" in kind or "v6" in kind or "v2" in kind or "v3" in kind:
        return 1
    # Megacore (v4 / v5p) and v7x: 2 TensorCores share a "parallel" grid axis.
    if "v4" in kind or "v5" in kind or "7" in kind:
        return 2
    return 1


def _mlu_kernel(x_ref, o_ref, *, inv_min_val, min_val):
    x = x_ref[...]
    xf = x.astype(jnp.float32)
    # x >= 0 -> x ;  x < 0 -> min_val * (exp(x / min_val) - 1)
    # exp(.) - 1 (instead of expm1) keeps the transcendental to one EUP push;
    # the extra subtract is free VPU filler for this bandwidth-bound kernel.
    neg = min_val * (jnp.exp(xf * inv_min_val) - 1.0)
    o_ref[...] = jnp.where(xf >= 0.0, xf, neg).astype(o_ref.dtype)


def mlu(x, min_val):
    """Applies MLU elementwise to an arbitrarily-shaped array."""
    min_val = float(min_val)          # module hyperparameter: static Python number
    if min_val <= 0:
        raise ValueError("MLU requires min_val > 0")   # fused form assumes it

    orig_shape = x.shape
    orig_dtype = x.dtype
    n = x.size
    if n == 0:
        return x

    flat = x.reshape(-1)

    # Pad only the <128-element tail needed to form a (rows, 128) slab.  The
    # aligned case (typical conv feature maps) does no pad and no final slice.
    rem = n % LANE
    if rem:
        flat = jnp.pad(flat, (0, LANE - rem))
    rows = flat.shape[0] // LANE
    x2d = flat.reshape(rows, LANE)

    itemsize = jnp.dtype(orig_dtype).itemsize
    sub_mult = max(SUBLANE, 32 // max(itemsize, 1))   # 8 f32 / 16 bf16 / 32 int8

    # Dtype-aware block rows: ~4 MiB per block regardless of itemsize.
    br_full = max(sub_mult,
                  (_TARGET_BLOCK_BYTES // (LANE * itemsize)) // sub_mult * sub_mult)

    num_tc = _num_tensorcores()
    if num_tc > 1 and rows > 2 * num_tc * sub_mult:
        # >= 2 blocks per TensorCore: per-core double-buffered pipelining and
        # core balance on 2-TC chips.
        cap = _round_up(pl.cdiv(rows, 2 * num_tc), sub_mult)
        br = max(sub_mult, min(br_full, cap))
    elif rows <= br_full:
        # Single TC (or tiny input): one block — no forced grid split overhead.
        br = rows
    else:
        br = br_full
    grid = (pl.cdiv(rows, br),)

    block_bytes = br * LANE * itemsize
    # in + out, double-buffered, plus headroom for compiler-internal scratch.
    vmem_limit = max(4 * block_bytes + (4 << 20), 16 << 20)

    kernel = functools.partial(
        _mlu_kernel,
        inv_min_val=float(1.0 / min_val),
        min_val=min_val,
    )

    cost = pl.CostEstimate(
        flops=5 * n,
        transcendentals=n,
        bytes_accessed=2 * n * itemsize,
    )

    out2d = pl.pallas_call(
        kernel,
        out_shape=jax.ShapeDtypeStruct((rows, LANE), orig_dtype),
        grid=grid,
        in_specs=[pl.BlockSpec((br, LANE), lambda i: (i, 0))],
        out_specs=pl.BlockSpec((br, LANE), lambda i: (i, 0)),
        compiler_params=pltpu.CompilerParams(
            dimension_semantics=("parallel",),
            vmem_limit_bytes=int(vmem_limit),
        ),
        cost_estimate=cost,
    )(x2d)

    out_flat = out2d.reshape(-1)
    if rem:
        out_flat = out_flat[:n]
    return out_flat.reshape(orig_shape)


def mlu_reference(x, min_val):
    """Pure-JAX reference matching F.elu(F.leaky_relu(x, 1/min_val), min_val)."""
    xf = x.astype(jnp.float32)
    y = jnp.where(xf >= 0.0, xf, (1.0 / min_val) * xf)
    return jnp.where(y > 0.0, y, min_val * (jnp.exp(y) - 1.0))


if __name__ == "__main__":
    key = jax.random.PRNGKey(0)
    k1, k2 = jax.random.split(key)
    min_val = 0.05   # module hyperparameter (deterministic, set in-script)

    # Small NCHW conv feature map, consistent with how MLU is used.
    x = jax.random.normal(k1, (2, 4, 16, 16), dtype=jnp.float32)
    out = jax.block_until_ready(mlu(x, min_val))
    ref = mlu_reference(x, min_val)
    assert out.shape == x.shape and out.dtype == x.dtype
    assert jnp.allclose(out, ref, atol=1e-6, rtol=1e-5), "mismatch vs reference"

    # Unaligned size (n % 128 != 0) to exercise the minimal-pad tail path.
    x2 = jax.random.normal(k2, (3, 5, 7), dtype=jnp.float32)
    out2 = jax.block_until_ready(mlu(x2, min_val))
    ref2 = mlu_reference(x2, min_val)
    assert out2.shape == x2.shape and out2.dtype == x2.dtype
    assert jnp.allclose(out2, ref2, atol=1e-6, rtol=1e-5), "mismatch (unaligned)"

    print("KERNEL_OK")
</pallas_src>

<mosaic_0001>
module attributes {stable_mosaic.version = 11 : i64} {
  func.func @_mlu_kernel(%arg0: i32, %arg1: memref<16x128xf32, #tpu.memory_space<vmem>>, %arg2: memref<16x128xf32, #tpu.memory_space<vmem>>) attributes {dimension_semantics = [#tpu.dimension_semantics<parallel>], iteration_bounds = array<i64: 1>, scalar_prefetch = 0 : i64, scratch_operands = 0 : i64, tpu.core_type = #tpu.core_type<tc>, window_params = [{transform_indices = @transform_0, window_bounds = array<i64: 16, 128>}, {transform_indices = @transform_1, window_bounds = array<i64: 16, 128>}]} {
    %c0 = arith.constant 0 : index
    %c0_0 = arith.constant 0 : index
    %0 = vector.load %arg1[%c0, %c0_0] : memref<16x128xf32, #tpu.memory_space<vmem>>, vector<16x128xf32>
    %cst = arith.constant 2.000000e+01 : f32
    %1 = vector.broadcast %cst : f32 to vector<16x128xf32>
    %2 = arith.mulf %0, %1 : vector<16x128xf32>
    %3 = math.exp %2 : vector<16x128xf32>
    %cst_1 = arith.constant 1.000000e+00 : f32
    %4 = vector.broadcast %cst_1 : f32 to vector<16x128xf32>
    %5 = arith.subf %3, %4 : vector<16x128xf32>
    %cst_2 = arith.constant 5.000000e-02 : f32
    %6 = vector.broadcast %cst_2 : f32 to vector<16x128xf32>
    %7 = arith.mulf %6, %5 : vector<16x128xf32>
    %cst_3 = arith.constant 0.000000e+00 : f32
    %8 = vector.broadcast %cst_3 : f32 to vector<16x128xf32>
    %9 = arith.cmpf oge, %0, %8 : vector<16x128xf32>
    %10 = arith.select %9, %0, %7 : vector<16x128xi1>, vector<16x128xf32>
    %c0_4 = arith.constant 0 : index
    %c0_5 = arith.constant 0 : index
    %11 = vector.load %arg2[%c0_4, %c0_5] : memref<16x128xf32, #tpu.memory_space<vmem>>, vector<16x128xf32>
    tpu.vector_store %arg2[%c0_4, %c0_5], %10 {strides = array<i32>} : memref<16x128xf32, #tpu.memory_space<vmem>>, vector<16x128xf32>,
    return
  }
  func.func @transform_0(%arg0: i32) -> (i32, i32) {
    %c0_i32 = arith.constant 0 : i32
    %c0_i32_0 = arith.constant 0 : i32
    return %arg0, %c0_i32 : i32, i32
  }
  func.func @transform_1(%arg0: i32) -> (i32, i32) {
    %c0_i32 = arith.constant 0 : i32
    %c0_i32_0 = arith.constant 0 : i32
    return %arg0, %c0_i32 : i32, i32
  }
}

</mosaic_0001>

<bundles_post_ra>
// kernel: tpu_custom_call.1
= control target key start
LH: loop header
LB: loop body
LE: loop exit
PB: predicated region body
PF: predicated region fallthrough
CT: control target
= control target key end

     0   :  { %6 = vsyncpa [#allocation3], 0  ;;  %s138_s0 = inlined_call_operand.hbm [shape: f32[16,128], index: 0, kind: input, shape index: {}]   ;;  %s139_s1 = inlined_call_operand.hbm [shape: f32[16,128], index: 1, kind: output, shape index: {}]  }
   0x1   :  { %7 = vsyncpa [#allocation4], 0  ;;  %s112_s6 = smov [#allocation2]  }
   0x2   :  { %s13_s7 = sshll.u32 %s112_s6, 4  ;;  %s14_s7 = int_to_ptr.vmem [resolvable:$true] %s13_s7 }
   0x3   :  { %s76_s8 = scalar_lea.vmem %s14_s7, 256  ;;  %p81_p1 = scmp.lt.s32.totalorder %s14_s7, %s14_s7 }
   0x4   :  { %p77_p0 = scmp.ne.s32.totalorder %s14_s7, %s76_s8  ;;  %p82_p2 = scmp.lt.s32.totalorder %s76_s8, %s76_s8 }
   0x6   :  { %p83_p3 = por %p82_p2, %p81_p1 }
   0x8   :  { %p84_p4 = pnand %p83_p3, %p77_p0 }
   0xa   :  { %87 = shalt.err (!%p84_p4)
}
   0xb   :  { %s113_s9 = smov 128   ;;  %s114_s10 = smov 8  }
   0xc   :  { %19 = dma.hbm_to_vmem [thread:$0]  %s138_s0, 256, %s14_s7, [#allocation3], %s113_s9, %s113_s9, %s114_s10  }
   0xd   :  { %108 = dma.done.wait [#allocation3], 256  }
   0xe   :  { %109 = vsyncadd [#allocation3], 4294967040  ;;  %v23_v0 = vld [vmem:[#allocation2] sm:$0xff]  ;;  %v24_v1 = vld [vmem:[#allocation2 + $0x8] sm:$0xff]  ;;  %s115_s13 = smov [#allocation5]  }
   0xf   :  { %v25_v2 = vmul.f32 20.0, %v23_v0  ;;  %v26_v3 = vmul.f32 20.0, %v24_v1  ;;  %vm35_vm0 = vcmp.ge.f32.partialorder %v23_v0, 0.0  ;;  %s46_s14 = sshll.u32 %s115_s13, 4  ;;  %vm36_vm1 = vcmp.ge.f32.partialorder %v24_v1, 0.0  ;;  %s47_s14 = int_to_ptr.vmem [resolvable:$true] %s46_s14 }
  0x10   :  { %s88_s0 = scalar_lea.vmem %s47_s14, 256  ;;  %p93_p6 = scmp.lt.s32.totalorder %s47_s14, %s47_s14 }
  0x11   :  { %v27_v4 = vmul.f32 1.442695, %v25_v2  ;;  %v29_v5 = vmul.f32 1.442695, %v26_v3  ;;  %p89_p5 = scmp.ne.s32.totalorder %s47_s14, %s88_s0  ;;  %p94_p7 = scmp.lt.s32.totalorder %s88_s0, %s88_s0 }
  0x13   :  { %64 = vpow2.f32 %v27_v4  ;;  %p95_p8 = por %p94_p7, %p93_p6 }
  0x14   :  { %66 = vpow2.f32 %v29_v5 }
  0x15   :  { %p96_p9 = pnand %p95_p8, %p89_p5 }
  0x20   :  { %v65_v6 = vpop.eup %64 }
  0x21   :  { %v67_v7 = vpop.eup %66  ;;  %v58_v8 = vadd.f32 -1.0, %v65_v6 }
  0x22   :  { %v59_v9 = vadd.f32 -1.0, %v67_v7 }
  0x23   :  { %v33_v10 = vmul.f32 0.05, %v58_v8 }
  0x24   :  { %v34_v11 = vmul.f32 0.05, %v59_v9 }
  0x25   :  { %v37_v12 = vsel %vm35_vm0, %v23_v0, %v33_v10 }
  0x26   :  { %39 = vst [vmem:[#allocation5] sm:$0xff] %v37_v12  ;;  %v38_v13 = vsel %vm36_vm1, %v24_v1, %v34_v11 }
  0x27   :  { %40 = vst [vmem:[#allocation5 + $0x8] sm:$0xff] %v38_v13 }
  0x28   :  { %99 = shalt.err (!%p96_p9)
}
  0x29   :  { %52 = dma.vmem_to_hbm [thread:$0]  %s47_s14, 256, %s139_s1, [#allocation4], %s113_s9, %s113_s9, %s114_s10  }
  0x2a   :  { %110 = dma.done.wait [#allocation4], 256  }
  0x2b   :  { %111 = vsyncadd [#allocation4], 4294967040 }
  0x2c   :  { %56 = vsyncpa [#allocation3], 1 }
  0x2d   :  { %57 = vsyncpa [#allocation4], 1 }

</bundles_post_ra>
